<compile_context>
chip_gen: v7x
topology: tpu7x:2x2x1
jax: 0.10.0
libtpu: 0.0.40
codegen_flags: <defaults>
</compile_context>

<pallas_src>
import functools

import jax
import jax.numpy as jnp
from jax.experimental import pallas as pl
from jax.experimental.pallas import tpu as pltpu

LANES = 128
SUBLANES = 8
DEFAULT_BLOCK_ROWS = 2048  # f32: 1 MiB / input block; 4 MiB double-buffered.


def _round_up(x, m):
    return ((x + m - 1) // m) * m


def _row_align(dtype):
    """Sublane alignment for packed sub-32-bit dtypes (bf16->16, int8->32)."""
    itemsize = jnp.dtype(dtype).itemsize
    return SUBLANES * max(1, 4 // itemsize)


# --------------------------------------------------------------------------
# Reduction ('mean' / 'sum') kernel
# --------------------------------------------------------------------------
def _charbonnier_sum_kernel(pred_ref, targ_ref, out_ref, *, eps, block,
                            n_inner, n_full_blocks, full_rows, rem, need_mask):
    """Accumulates an (8,128) vector of partial sums of sqrt((p-t)^2 + eps).

    grid = (n_outer ["parallel"], n_inner ["arbitrary"]).  The (1, 8, 128)
    output block for a given outer index stays VMEM-resident across the inner
    reduction axis, so it doubles as the accumulator (init at inner step 0).

    Blocks whose flat index b < n_full_blocks are fully valid and accumulate
    unmasked.  Boundary / duplicate blocks (b >= n_full_blocks) mask elements
    whose global index >= total via an iota compare, so padded or undefined
    (edge / duplicated) data contributes exactly zero — no pad compensation.
    """
    i = pl.program_id(1)

    @pl.when(i == 0)
    def _():
        out_ref[...] = jnp.zeros_like(out_ref)

    d = pred_ref[...].astype(jnp.float32) - targ_ref[...].astype(jnp.float32)
    val = jnp.sqrt(d * d + jnp.float32(eps))

    def accumulate(v):
        # Reduce only across (8,128)-aligned chunks: pure element-wise VPU
        # adds.  The final cross-lane reduce of the (8,128) partial is done
        # once, in JAX, on the kernel output.
        partial = jnp.sum(v.reshape(block // SUBLANES, SUBLANES, LANES), axis=0)
        out_ref[...] += partial.reshape(out_ref.shape)

    if not need_mask:  # static: every block of the grid is fully valid
        accumulate(val)
    else:
        b = pl.program_id(0) * n_inner + i  # flat (unclamped) block index

        @pl.when(b < n_full_blocks)
        def _():
            accumulate(val)

        @pl.when(b >= n_full_blocks)
        def _():
            row = jax.lax.broadcasted_iota(jnp.int32, (block, LANES), 0) + b * block
            mask = row < full_rows
            if rem:  # partial last lane-row (total % 128 != 0)
                lane = jax.lax.broadcasted_iota(jnp.int32, (block, LANES), 1)
                mask = mask | ((row == full_rows) & (lane < rem))
            accumulate(jnp.where(mask, val, jnp.float32(0.0)))


# --------------------------------------------------------------------------
# Elementwise ('none') kernel
# --------------------------------------------------------------------------
def _charbonnier_ew_kernel(pred_ref, targ_ref, out_ref, *, eps, loss_weight):
    d = pred_ref[...].astype(jnp.float32) - targ_ref[...].astype(jnp.float32)
    out = jnp.float32(loss_weight) * jnp.sqrt(d * d + jnp.float32(eps))
    out_ref[...] = out.astype(out_ref.dtype)


def _charbonnier_elementwise(pred, target, *, loss_weight, eps, block_rows):
    shape = pred.shape
    total = int(pred.size)
    out_dtype = jnp.promote_types(pred.dtype, target.dtype)

    if total % LANES != 0:
        # Lane-ragged sizes: any Pallas (rows,128) layout would force a
        # pad + [:total] slice round trip through HBM (~2x traffic for this
        # 3-stream elementwise op).  XLA's fused elementwise is copy-free and
        # already at the HBM roofline, so use it for this rare case.
        d = pred.astype(jnp.float32) - target.astype(jnp.float32)
        out = jnp.float32(loss_weight) * jnp.sqrt(d * d + jnp.float32(eps))
        return out.astype(out_dtype)

    rows = total // LANES
    align = _row_align(pred.dtype)
    block = min(_round_up(block_rows, align), _round_up(rows, align))
    grid = (pl.cdiv(rows, block),)

    pred2d = pred.reshape(rows, LANES)     # reshape only — no pad, no copy
    targ2d = target.reshape(rows, LANES)

    itemsize = jnp.dtype(pred.dtype).itemsize
    bytes_accessed = total * (itemsize + jnp.dtype(target.dtype).itemsize
                              + jnp.dtype(out_dtype).itemsize)

    out2d = pl.pallas_call(
        functools.partial(_charbonnier_ew_kernel, eps=eps,
                          loss_weight=loss_weight),
        out_shape=jax.ShapeDtypeStruct((rows, LANES), out_dtype),
        grid_spec=pltpu.PrefetchScalarGridSpec(
            num_scalar_prefetch=0,
            grid=grid,
            in_specs=[pl.BlockSpec((block, LANES), lambda i: (i, 0)),
                      pl.BlockSpec((block, LANES), lambda i: (i, 0))],
            out_specs=pl.BlockSpec((block, LANES), lambda i: (i, 0)),
        ),
        compiler_params=pltpu.CompilerParams(
            dimension_semantics=("parallel",)),
        cost_estimate=pl.CostEstimate(flops=3 * total, transcendentals=total,
                                      bytes_accessed=bytes_accessed),
    )(pred2d, targ2d)
    return out2d.reshape(shape)            # exact size: no slice copy


# --------------------------------------------------------------------------
# Public entry point (CharbonnierLoss.forward equivalent)
# --------------------------------------------------------------------------
def charbonnier_loss(pred, target, weight=None, *, loss_weight=1.0,
                     reduction="mean", eps=1e-12,
                     block_rows=DEFAULT_BLOCK_ROWS, split_outer=2):
    """JAX/Pallas equivalent of basicsr CharbonnierLoss.forward (weight=None).

    pred, target: (N, C, H, W) arrays (any dtype; math is done in f32).
    """
    if reduction not in ("none", "mean", "sum"):
        raise ValueError(f"Unsupported reduction mode: {reduction}")
    if weight is not None:
        # TODO(synk): basicsr's weighted path (elementwise weight and
        # weight-sum normalization for 'mean') is not implemented here.
        raise NotImplementedError("weight is not supported in this kernel")
    if pred.shape != target.shape:
        raise ValueError("pred and target must have the same shape")

    if reduction == "none":
        return _charbonnier_elementwise(pred, target, loss_weight=loss_weight,
                                        eps=eps, block_rows=block_rows)

    total = int(pred.size)
    align = _row_align(pred.dtype)
    block_rows = _round_up(block_rows, align)

    full_rows = total // LANES
    rem = total % LANES

    pred_f = pred.reshape(-1)
    targ_f = target.reshape(-1)
    if rem:
        # Only truly lane-ragged sizes pad, and only by < 128 elements; the
        # padded tail is masked out inside the kernel (no sqrt(eps) fixup).
        pad = LANES - rem
        pred_f = jnp.pad(pred_f, (0, pad))
        targ_f = jnp.pad(targ_f, (0, pad))
        rows_arr = full_rows + 1
    else:
        rows_arr = full_rows          # zero-copy common case
    pred2d = pred_f.reshape(rows_arr, LANES)
    targ2d = targ_f.reshape(rows_arr, LANES)

    if rows_arr <= block_rows:
        block = _round_up(rows_arr, align)
        num_blocks = 1
    else:
        block = block_rows
        num_blocks = pl.cdiv(rows_arr, block)

    # Leading "parallel" axis lets v7x's two TensorCores split the rows; on
    # single-TC chips it is just an outer loop with near-zero cost.
    n_outer = split_outer if (split_outer > 1 and num_blocks >= split_outer) else 1
    n_inner = pl.cdiv(num_blocks, n_outer)
    total_blocks = n_outer * n_inner
    last_block = num_blocks - 1

    # A block is fully valid iff all block*128 of its elements are < total.
    n_full_blocks = total // (block * LANES)
    need_mask = n_full_blocks < total_blocks

    def in_map(o, i):
        b = o * n_inner + i
        if total_blocks > num_blocks:
            # Duplicate grid steps (odd block count under the outer split):
            # re-read the last real block — no OOB DMA — and the in-kernel
            # mask zeroes its contribution.
            b = jnp.minimum(b, last_block)
        return (b, 0)

    kernel = functools.partial(
        _charbonnier_sum_kernel, eps=eps, block=block, n_inner=n_inner,
        n_full_blocks=n_full_blocks, full_rows=full_rows, rem=rem,
        need_mask=need_mask)

    itemsize_p = jnp.dtype(pred.dtype).itemsize
    itemsize_t = jnp.dtype(target.dtype).itemsize
    bytes_accessed = total * (itemsize_p + itemsize_t) + n_outer * SUBLANES * LANES * 4

    partials = pl.pallas_call(
        kernel,
        out_shape=jax.ShapeDtypeStruct((n_outer, SUBLANES, LANES), jnp.float32),
        grid_spec=pltpu.PrefetchScalarGridSpec(
            num_scalar_prefetch=0,
            grid=(n_outer, n_inner),
            in_specs=[pl.BlockSpec((block, LANES), in_map),
                      pl.BlockSpec((block, LANES), in_map)],
            out_specs=pl.BlockSpec((1, SUBLANES, LANES), lambda o, i: (o, 0, 0)),
        ),
        compiler_params=pltpu.CompilerParams(
            dimension_semantics=("parallel", "arbitrary")),
        cost_estimate=pl.CostEstimate(flops=4 * total, transcendentals=total,
                                      bytes_accessed=bytes_accessed),
    )(pred2d, targ2d)

    # Note: sequential f32 accumulation; for >~1e8 elements expect ~1e-5
    # relative drift vs a pairwise/f64 reference (comparable to PyTorch f32).
    total_sum = jnp.sum(partials, dtype=jnp.float32)

    if reduction == "mean":
        result = total_sum / jnp.float32(total)
    else:  # "sum"
        result = total_sum
    return jnp.float32(loss_weight) * result


if __name__ == "__main__":
    # Small NCHW inputs consistent with the module's forward.
    N, C, H, W = 2, 4, 16, 16
    key = jax.random.PRNGKey(0)
    k1, k2, k3, k4 = jax.random.split(key, 4)
    pred = jax.random.normal(k1, (N, C, H, W), dtype=jnp.float32)
    target = jax.random.normal(k2, (N, C, H, W), dtype=jnp.float32)

    loss_weight = 1.0
    eps = 1e-12

    # 'mean' reduction (zero-copy fast path: total % 128 == 0).
    loss = jax.block_until_ready(
        charbonnier_loss(pred, target, loss_weight=loss_weight,
                         reduction="mean", eps=eps))
    ref = loss_weight * jnp.mean(jnp.sqrt((pred - target) ** 2 + eps))
    assert jnp.allclose(loss, ref, rtol=1e-5, atol=1e-6), (loss, ref)

    # 'sum' reduction.
    loss_sum = jax.block_until_ready(
        charbonnier_loss(pred, target, loss_weight=loss_weight,
                         reduction="sum", eps=eps))
    ref_sum = loss_weight * jnp.sum(jnp.sqrt((pred - target) ** 2 + eps))
    assert jnp.allclose(loss_sum, ref_sum, rtol=1e-5, atol=1e-4), (loss_sum, ref_sum)

    # 'none' reduction (zero-copy fast path).
    loss_none = jax.block_until_ready(
        charbonnier_loss(pred, target, loss_weight=loss_weight,
                         reduction="none", eps=eps))
    ref_none = loss_weight * jnp.sqrt((pred - target) ** 2 + eps)
    assert loss_none.shape == (N, C, H, W)
    assert jnp.allclose(loss_none, ref_none, rtol=1e-5, atol=1e-6)

    # Odd (lane-ragged) shape: exercises minimal pad + in-kernel masking.
    pred_o = jax.random.normal(k3, (2, 3, 15, 17), dtype=jnp.float32)
    target_o = jax.random.normal(k4, (2, 3, 15, 17), dtype=jnp.float32)
    loss_o = jax.block_until_ready(
        charbonnier_loss(pred_o, target_o, loss_weight=loss_weight,
                         reduction="mean", eps=eps))
    ref_o = loss_weight * jnp.mean(jnp.sqrt((pred_o - target_o) ** 2 + eps))
    assert jnp.allclose(loss_o, ref_o, rtol=1e-5, atol=1e-6), (loss_o, ref_o)

    # bf16 inputs: native-dtype HBM reads, f32 math in-kernel.
    pred_b = pred.astype(jnp.bfloat16)
    target_b = target.astype(jnp.bfloat16)
    loss_b = jax.block_until_ready(
        charbonnier_loss(pred_b, target_b, loss_weight=loss_weight,
                         reduction="mean", eps=eps))
    ref_b = loss_weight * jnp.mean(jnp.sqrt(
        (pred_b.astype(jnp.float32) - target_b.astype(jnp.float32)) ** 2 + eps))
    assert jnp.allclose(loss_b, ref_b, rtol=1e-4, atol=1e-5), (loss_b, ref_b)

    print("KERNEL_OK")
</pallas_src>

<mosaic_0001>
module attributes {stable_mosaic.version = 11 : i64} {
  func.func @_charbonnier_sum_kernel(%arg0: i32, %arg1: i32, %arg2: memref<16x128xf32, #tpu.memory_space<vmem>>, %arg3: memref<16x128xf32, #tpu.memory_space<vmem>>, %arg4: memref<1x8x128xf32, #tpu.memory_space<vmem>>) attributes {dimension_semantics = [#tpu.dimension_semantics<parallel>, #tpu.dimension_semantics<arbitrary>], iteration_bounds = array<i64: 1, 1>, scalar_prefetch = 0 : i64, scratch_operands = 0 : i64, tpu.core_type = #tpu.core_type<tc>, window_params = [{transform_indices = @transform_0, window_bounds = array<i64: 16, 128>}, {transform_indices = @transform_1, window_bounds = array<i64: 16, 128>}, {transform_indices = @transform_2, window_bounds = array<i64: 1, 8, 128>}]} {
    %c0_i32 = arith.constant 0 : i32
    %0 = arith.cmpi eq, %arg1, %c0_i32 : i32
    %1 = arith.extui %0 : i1 to i32
    %c0_i32_0 = arith.constant 0 : i32
    %2 = arith.cmpi ne, %1, %c0_i32_0 : i32
    scf.if %2 {
      %cst_11 = arith.constant 0.000000e+00 : f32
      %16 = vector.broadcast %cst_11 : f32 to vector<1x8x128xf32>
      %c0_12 = arith.constant 0 : index
      %c0_13 = arith.constant 0 : index
      %c0_14 = arith.constant 0 : index
      %17 = vector.load %arg4[%c0_12, %c0_13, %c0_14] : memref<1x8x128xf32, #tpu.memory_space<vmem>>, vector<1x8x128xf32>
      tpu.vector_store %arg4[%c0_12, %c0_13, %c0_14], %16 {strides = array<i32>} : memref<1x8x128xf32, #tpu.memory_space<vmem>>, vector<1x8x128xf32>,
    } else {
    }
    %c0 = arith.constant 0 : index
    %c0_1 = arith.constant 0 : index
    %3 = vector.load %arg2[%c0, %c0_1] : memref<16x128xf32, #tpu.memory_space<vmem>>, vector<16x128xf32>
    %c0_2 = arith.constant 0 : index
    %c0_3 = arith.constant 0 : index
    %4 = vector.load %arg3[%c0_2, %c0_3] : memref<16x128xf32, #tpu.memory_space<vmem>>, vector<16x128xf32>
    %5 = arith.subf %3, %4 : vector<16x128xf32>
    %6 = arith.mulf %5, %5 : vector<16x128xf32>
    %cst = arith.constant 9.99999996E-13 : f32
    %7 = vector.broadcast %cst : f32 to vector<16x128xf32>
    %8 = arith.addf %6, %7 : vector<16x128xf32>
    %9 = math.sqrt %8 : vector<16x128xf32>
    %10 = vector.shape_cast %9 : vector<16x128xf32> to vector<2x8x128xf32>
    %cst_4 = arith.constant dense<0.000000e+00> : vector<8x128xf32>
    %11 = vector.multi_reduction <add>, %10, %cst_4 [0] : vector<2x8x128xf32> to vector<8x128xf32>
    %c0_5 = arith.constant 0 : index
    %c0_6 = arith.constant 0 : index
    %c0_7 = arith.constant 0 : index
    %12 = vector.load %arg4[%c0_5, %c0_6, %c0_7] : memref<1x8x128xf32, #tpu.memory_space<vmem>>, vector<1x8x128xf32>
    %13 = vector.shape_cast %11 : vector<8x128xf32> to vector<1x8x128xf32>
    %14 = arith.addf %12, %13 : vector<1x8x128xf32>
    %c0_8 = arith.constant 0 : index
    %c0_9 = arith.constant 0 : index
    %c0_10 = arith.constant 0 : index
    %15 = vector.load %arg4[%c0_8, %c0_9, %c0_10] : memref<1x8x128xf32, #tpu.memory_space<vmem>>, vector<1x8x128xf32>
    tpu.vector_store %arg4[%c0_8, %c0_9, %c0_10], %14 {strides = array<i32>} : memref<1x8x128xf32, #tpu.memory_space<vmem>>, vector<1x8x128xf32>,
    return
  }
  func.func @transform_0(%arg0: i32, %arg1: i32) -> (i32, i32) {
    %c1_i32 = arith.constant 1 : i32
    %0 = arith.muli %arg0, %c1_i32 : i32
    %1 = arith.addi %0, %arg1 : i32
    %c0_i32 = arith.constant 0 : i32
    %c0_i32_0 = arith.constant 0 : i32
    return %1, %c0_i32 : i32, i32
  }
  func.func @transform_1(%arg0: i32, %arg1: i32) -> (i32, i32) {
    %c1_i32 = arith.constant 1 : i32
    %0 = arith.muli %arg0, %c1_i32 : i32
    %1 = arith.addi %0, %arg1 : i32
    %c0_i32 = arith.constant 0 : i32
    %c0_i32_0 = arith.constant 0 : i32
    return %1, %c0_i32 : i32, i32
  }
  func.func @transform_2(%arg0: i32, %arg1: i32) -> (i32, i32, i32) {
    %c0_i32 = arith.constant 0 : i32
    %c0_i32_0 = arith.constant 0 : i32
    %c0_i32_1 = arith.constant 0 : i32
    return %arg0, %c0_i32, %c0_i32_0 : i32, i32, i32
  }
}

</mosaic_0001>

<bundles_post_ra>
// kernel: tpu_custom_call.1
= control target key start
LH: loop header
LB: loop body
LE: loop exit
PB: predicated region body
PF: predicated region fallthrough
CT: control target
= control target key end

     0   :  { %7 = vsyncpa [#allocation3], 0  ;;  %s239_s0 = inlined_call_operand.hbm [shape: f32[16,128], index: 0, kind: input, shape index: {}]   ;;  %s240_s1 = inlined_call_operand.hbm [shape: f32[16,128], index: 1, kind: input, shape index: {}]   ;;  %s241_s2 = inlined_call_operand.hbm [shape: f32[1,8,128], index: 2, kind: output, shape index: {}]  }
   0x1   :  { %8 = vsyncpa [#allocation6], 0 }
   0x2   :  { %9 = vsyncpa [#allocation4], 0  ;;  %s183_s9 = smov [#allocation2]   ;;  %s111_s13 = scalar_lea.hbm %s239_s0, 256 }
   0x3   :  { %s19_s10 = sshll.u32 %s183_s9, 4  ;;  %p112_p0 = scmp.ne.s32.totalorder %s239_s0, %s111_s13  ;;  %s20_s10 = int_to_ptr.vmem [resolvable:$true] %s19_s10 }
   0x4   :  { %p115_p1 = scmp.lt.u32.totalorder %s111_s13, %s239_s0 }
   0x6   :  { %p117_p2 = pnand %p115_p1, %p112_p0 }
   0x8   :  { %120 = shalt.err (!%p117_p2)
}
   0x9   :  { %s121_s18 = scalar_lea.vmem %s20_s10, 256  ;;  %p126_p4 = scmp.lt.s32.totalorder %s20_s10, %s20_s10 }
   0xa   :  { %p122_p3 = scmp.ne.s32.totalorder %s20_s10, %s121_s18  ;;  %p127_p5 = scmp.lt.s32.totalorder %s121_s18, %s121_s18 }
   0xc   :  { %p128_p6 = por %p127_p5, %p126_p4 }
   0xe   :  { %p129_p7 = pnand %p128_p6, %p122_p3 }
  0x10   :  { %132 = shalt.err (!%p129_p7)
}
  0x11   :  { %s184_s19 = smov 128   ;;  %s185_s20 = smov 8  }
  0x12   :  { %25 = dma.hbm_to_vmem [thread:$0]  %s239_s0, 256, %s20_s10, [#allocation3], %s184_s19, %s184_s19, %s185_s20  }
  0x13   :  { %s186_s23 = smov [#allocation5]   ;;  %s133_s27 = scalar_lea.hbm %s240_s1, 256 }
  0x14   :  { %s35_s24 = sshll.u32 %s186_s23, 4  ;;  %p134_p8 = scmp.ne.s32.totalorder %s240_s1, %s133_s27  ;;  %s36_s24 = int_to_ptr.vmem [resolvable:$true] %s35_s24 }
  0x15   :  { %p137_p9 = scmp.lt.u32.totalorder %s133_s27, %s240_s1 }
  0x17   :  { %p139_p10 = pnand %p137_p9, %p134_p8 }
  0x19   :  { %142 = shalt.err (!%p139_p10)
}
  0x1a   :  { %s143_s4 = scalar_lea.vmem %s36_s24, 256  ;;  %p148_p12 = scmp.lt.s32.totalorder %s36_s24, %s36_s24 }
  0x1b   :  { %p144_p11 = scmp.ne.s32.totalorder %s36_s24, %s143_s4  ;;  %p149_p13 = scmp.lt.s32.totalorder %s143_s4, %s143_s4 }
  0x1d   :  { %p150_p0 = por %p149_p13, %p148_p12 }
  0x1f   :  { %p151_p1 = pnand %p150_p0, %p144_p11 }
  0x21   :  { %154 = shalt.err (!%p151_p1)
}
  0x22   :  { %41 = dma.hbm_to_vmem [thread:$0]  %s240_s1, 256, %s36_s24, [#allocation6], %s184_s19, %s184_s19, %s185_s20  }
  0x23   :  { %177 = dma.done.wait [#allocation3], 256  }
  0x24   :  { %178 = vsyncadd [#allocation3], 4294967040 }
  0x25   :  { %179 = dma.done.wait [#allocation6], 256  }
  0x26   :  { %180 = vsyncadd [#allocation6], 4294967040  ;;  %v57_v0 = vld [vmem:[#allocation2] sm:$0xff]  ;;  %v58_v1 = vld [vmem:[#allocation2 + $0x8] sm:$0xff]  ;;  %s187_s1 = smov [#allocation7]  }
  0x27   :  { %v59_v2 = vld [vmem:[#allocation5] sm:$0xff]  ;;  %v60_v3 = vld [vmem:[#allocation5 + $0x8] sm:$0xff]  ;;  %s91_s6 = sshll.u32 %s187_s1, 4  ;;  %s92_s6 = int_to_ptr.vmem [resolvable:$true] %s91_s6 }
  0x28   :  { %v61_v4 = vsub.f32 %v57_v0, %v59_v2  ;;  %v62_v5 = vsub.f32 %v58_v1, %v60_v3  ;;  %s155_s7 = scalar_lea.vmem %s92_s6, 128  ;;  %p160_p3 = scmp.lt.s32.totalorder %s92_s6, %s92_s6 }
  0x29   :  { %p156_p2 = scmp.ne.s32.totalorder %s92_s6, %s155_s7  ;;  %p161_p4 = scmp.lt.s32.totalorder %s155_s7, %s155_s7 }
  0x2a   :  { %v63_v6 = vmul.f32 %v61_v4, %v61_v4  ;;  %v64_v7 = vmul.f32 %v62_v5, %v62_v5 }
  0x2b   :  { %p162_p5 = por %p161_p4, %p160_p3 }
  0x2c   :  { %v65_v8 = vadd.f32 1e-12, %v63_v6  ;;  %v66_v9 = vadd.f32 1e-12, %v64_v7 }
  0x2d   :  { %p163_p6 = pnand %p162_p5, %p156_p2 }
  0x2e   :  { %107 = vrsqrt.f32 %v65_v8  ;;  %vm69_vm0 = vcmp.eq.f32.partialorder %v65_v8, inf  ;;  %v72_v11 = vand.u32 2147483648, %v65_v8  ;;  %vm71_vm1 = vcmp.eq.f32.partialorder %v65_v8, 0.0 }
  0x2f   :  { %109 = vrsqrt.f32 %v66_v9  ;;  %vm76_vm2 = vcmp.eq.f32.partialorder %v66_v9, inf  ;;  %v79_v14 = vand.u32 2147483648, %v66_v9  ;;  %vm78_vm3 = vcmp.eq.f32.partialorder %v66_v9, 0.0 }
  0x38   :  { %v108_v10 = vpop.eup %107 }
  0x39   :  { %v110_v12 = vpop.eup %109  ;;  %v68_v13 = vmul.f32 %v108_v10, %v65_v8 }
  0x3a   :  { %v75_v15 = vmul.f32 %v110_v12, %v66_v9 }
  0x3b   :  { %v70_v16 = vsel %vm69_vm0, %v65_v8, %v68_v13 }
  0x3c   :  { %v73_v17 = vsel %vm71_vm1, %v72_v11, %v70_v16  ;;  %v77_v18 = vsel %vm76_vm2, %v66_v9, %v75_v15 }
  0x3d   :  { %v80_v19 = vsel %vm78_vm3, %v79_v14, %v77_v18 }
  0x3e   :  { %v81_v20 = vadd.f32 %v80_v19, %v73_v17 }
  0x40   :  { %84 = vst [vmem:[#allocation7] sm:$0xff] %v81_v20 }
  0x41   :  { %166 = shalt.err (!%p163_p6)
}
  0x42   :  { %s167_s10 = scalar_lea.hbm %s241_s2, 128 }
  0x43   :  { %p168_p7 = scmp.ne.s32.totalorder %s241_s2, %s167_s10  ;;  %p171_p8 = scmp.lt.u32.totalorder %s167_s10, %s241_s2 }
  0x45   :  { %p173_p9 = pnand %p171_p8, %p168_p7 }
  0x47   :  { %176 = shalt.err (!%p173_p9)
}
  0x48   :  { %94 = dma.vmem_to_hbm [thread:$0]  %s92_s6, 128, %s241_s2, [#allocation4]  }
  0x49   :  { %181 = dma.done.wait [#allocation4], 128  }
  0x4a   :  { %182 = vsyncadd [#allocation4], 4294967168 }
  0x4b   :  { %98 = vsyncpa [#allocation3], 1 }
  0x4c   :  { %99 = vsyncpa [#allocation6], 1 }
  0x4d   :  { %100 = vsyncpa [#allocation4], 1 }

</bundles_post_ra>
